<compile_context>
chip_gen: v7x
topology: tpu7x:2x2x1
jax: 0.10.0
libtpu: 0.0.40
codegen_flags: <defaults>
</compile_context>

<pallas_src>
import jax
import jax.numpy as jnp
from jax.experimental import pallas as pl
from jax.experimental.pallas import tpu as pltpu


def _leaky_relu(x, slope=0.01):
    # nn.LeakyReLU default negative_slope = 0.01
    return jnp.where(x >= 0, x, slope * x)


# ----------------------------------------------------------------------------
# One-time parameter preparation (outside the forward path).
# ----------------------------------------------------------------------------
def prepare_decoder_params(params, *, M, S, C):
    """Fuse conv1 -> conv2 -> linear0 -> linear1 (no activations in between)
    into a single (M*S*C, 64) weight + (64,) bias, and pre-shape layer2."""
    MS = M * S
    MSC = MS * C
    # l1_filter: Conv1d(MS, MS, kernel_size=C) on (B, MS, C) -> exact matmul.
    w1t = params["w1"].reshape(MS, MSC).T              # (MSC, MS)
    # l2_filter: Conv1d(M, M, kernel_size=S) on (B, M, S) -> exact matmul.
    w2t = params["w2"].reshape(M, MS).T                # (MS, M)
    # Linear layers: torch stores (out, in); transpose for x @ W.
    w0t = params["w0"].T                               # (M, 256)
    wl1t = params["wl1"].T                             # (256, 64)

    w_fused = w1t @ (w2t @ (w0t @ wl1t))               # (MSC, 64)
    b_fused = ((params["b1"] @ w2t + params["b2"]) @ w0t
               + params["c0"]) @ wl1t + params["c1"]   # (64,)

    return {
        "w_fused": jnp.asarray(w_fused, jnp.float32),              # (MSC, 64)
        "b_fused": jnp.asarray(b_fused, jnp.float32).reshape(1, 64),
        "wl2_row": jnp.asarray(params["wl2"], jnp.float32).reshape(1, 64),
        "c2": jnp.asarray(params["c2"], jnp.float32).reshape(1, 1),
    }


# ----------------------------------------------------------------------------
# Kernel.
# ----------------------------------------------------------------------------
def decoder_kernel(x_ref, wf_ref, bf_ref, wl2_ref, c2_ref, o_ref):
    # Fused (l1_filter o l2_filter o layer0 o layer1): one MXU matmul.
    h = jnp.dot(x_ref[...], wf_ref[...],
                preferred_element_type=jnp.float32) + bf_ref[...]     # (TB, 64)
    h = _leaky_relu(h)
    # layer2 (64 -> 1), oriented as (1,64) . (TB,64)^T so the result is a
    # lane-dense (1, TB) row (same A @ B^T pattern as q @ k^T).
    z = jax.lax.dot_general(
        wl2_ref[...], h,
        dimension_numbers=(((1,), (1,)), ((), ())),
        preferred_element_type=jnp.float32)                           # (1, TB)
    z = _leaky_relu(z + c2_ref[...])
    o_ref[...] = jax.nn.sigmoid(z)[None].astype(o_ref.dtype)          # (1, 1, TB)


# ----------------------------------------------------------------------------
# Wrapper.
# ----------------------------------------------------------------------------
_VMEM_BUDGET = 32 * 1024 * 1024   # conservative: v7x has 64 MiB physical VMEM


def _pick_tb(batch, msc):
    """Batch tile: multiple of 8 (f32 sublanes), <=256, >=2 grid blocks when
    the batch allows (v7x megacore), and within a conservative VMEM budget."""
    w_bytes = 2 * 4 * (msc * 64 + 3 * 64)          # resident weights (double-buffered)
    per_row = 2 * 4 * (msc + 1)                    # x tile + out tile, double-buffered
    cap = max(8, (_VMEM_BUDGET - w_bytes) // per_row)
    tb = min(256, (batch + 1) // 2, cap)
    return max(8, (tb // 8) * 8)


def decoder_forward(x, fused_params, *, tb=None):
    """x: (B, M, S, C) float32 (encoder_to_decoder layout). Returns (B, 1)."""
    B = x.shape[0]
    w_fused = fused_params["w_fused"]
    MSC = w_fused.shape[0]

    x_flat = x.reshape(B, MSC)

    TB = tb if tb is not None else _pick_tb(B, MSC)
    G = pl.cdiv(B, TB)
    B_pad = G * TB
    if B_pad != B:
        x_flat = jnp.pad(x_flat, ((0, B_pad - B), (0, 0)))

    vmem_need = 4 * (2 * TB * MSC + 2 * TB + 2 * (MSC * 64 + 3 * 64 + 1)) + (2 << 20)
    vmem_limit = int(min(max(vmem_need, 16 << 20), 96 << 20))

    cost = pl.CostEstimate(
        flops=2 * B_pad * MSC * 64 + 2 * B_pad * 64,
        transcendentals=B_pad,                       # sigmoid
        bytes_accessed=4 * (B_pad * MSC + MSC * 64 + 3 * 64 + 1 + B_pad),
    )

    out = pl.pallas_call(
        decoder_kernel,
        out_shape=jax.ShapeDtypeStruct((G, 1, TB), jnp.float32),
        grid=(G,),
        in_specs=[
            pl.BlockSpec((TB, MSC), lambda i: (i, 0)),     # x tile (pipelined)
            pl.BlockSpec((MSC, 64), lambda i: (0, 0)),     # fused weight (resident)
            pl.BlockSpec((1, 64), lambda i: (0, 0)),       # fused bias
            pl.BlockSpec((1, 64), lambda i: (0, 0)),       # layer2 weight row
            pl.BlockSpec((1, 1), lambda i: (0, 0)),        # layer2 bias
        ],
        out_specs=pl.BlockSpec((1, 1, TB), lambda i: (i, 0, 0)),  # lane-dense slab
        compiler_params=pltpu.CompilerParams(
            dimension_semantics=("parallel",),
            vmem_limit_bytes=vmem_limit,
        ),
        cost_estimate=cost,
    )(x_flat, w_fused, fused_params["b_fused"],
      fused_params["wl2_row"], fused_params["c2"])

    return out.reshape(B_pad, 1)[:B]


# ----------------------------------------------------------------------------
# Pure-JAX reference (unfused, matches the PyTorch forward op-by-op).
# ----------------------------------------------------------------------------
def decoder_reference(x, params, *, B, M, S, C):
    MS = M * S
    h = x.reshape(B, MS * C) @ params["w1"].reshape(MS, MS * C).T + params["b1"]
    h = h.reshape(B, MS) @ params["w2"].reshape(M, MS).T + params["b2"]
    h = h @ params["w0"].T + params["c0"]
    h = h @ params["wl1"].T + params["c1"]
    h = _leaky_relu(h)
    h = h @ params["wl2"].T + params["c2"]
    h = _leaky_relu(h)
    return jax.nn.sigmoid(h)


def init_params(key, *, M, S, C):
    MS = M * S
    ks = jax.random.split(key, 10)
    scale = 0.1
    return {
        "w1": scale * jax.random.normal(ks[0], (MS, MS, C), jnp.float32),
        "b1": scale * jax.random.normal(ks[1], (MS,), jnp.float32),
        "w2": scale * jax.random.normal(ks[2], (M, M, S), jnp.float32),
        "b2": scale * jax.random.normal(ks[3], (M,), jnp.float32),
        "w0": scale * jax.random.normal(ks[4], (256, M), jnp.float32),
        "c0": scale * jax.random.normal(ks[5], (256,), jnp.float32),
        "wl1": scale * jax.random.normal(ks[6], (64, 256), jnp.float32),
        "c1": scale * jax.random.normal(ks[7], (64,), jnp.float32),
        "wl2": scale * jax.random.normal(ks[8], (1, 64), jnp.float32),
        "c2": scale * jax.random.normal(ks[9], (1,), jnp.float32),
    }


if __name__ == "__main__":
    # Small shapes consistent with the module's forward: x viewable as (B, M, S, C).
    # B chosen large enough to exercise batch tiling (TB=256 -> 2 parallel grid blocks).
    B, M, S, C = 512, 4, 4, 8

    key = jax.random.PRNGKey(0)
    kx, kp = jax.random.split(key)
    x = jax.random.normal(kx, (B, M, S, C), jnp.float32)
    params = init_params(kp, M=M, S=S, C=C)

    # One-time parameter prep (fusion + transposes) outside the forward path.
    fused = prepare_decoder_params(params, M=M, S=S, C=C)

    fwd = jax.jit(decoder_forward)
    y = fwd(x, fused)
    jax.block_until_ready(y)

    y_ref = decoder_reference(x, params, B=B, M=M, S=S, C=C)
    assert y.shape == (B, 1)
    assert jnp.allclose(y, y_ref, rtol=1e-3, atol=1e-4), float(jnp.max(jnp.abs(y - y_ref)))

    print("KERNEL_OK")
</pallas_src>

<mosaic_0001>
module attributes {stable_mosaic.version = 11 : i64} {
  func.func @decoder_kernel(%arg0: i32, %arg1: memref<256x128xf32, #tpu.memory_space<vmem>>, %arg2: memref<128x64xf32, #tpu.memory_space<vmem>>, %arg3: memref<1x64xf32, #tpu.memory_space<vmem>>, %arg4: memref<1x64xf32, #tpu.memory_space<vmem>>, %arg5: memref<1x1xf32, #tpu.memory_space<vmem>>, %arg6: memref<1x1x256xf32, #tpu.memory_space<vmem>>) attributes {dimension_semantics = [#tpu.dimension_semantics<parallel>], iteration_bounds = array<i64: 2>, scalar_prefetch = 0 : i64, scratch_operands = 0 : i64, tpu.core_type = #tpu.core_type<tc>, window_params = [{transform_indices = @transform_0, window_bounds = array<i64: 256, 128>}, {pipeline_mode = #tpu.pipeline_mode<synchronous>, transform_indices = @transform_1, window_bounds = array<i64: 128, 64>}, {pipeline_mode = #tpu.pipeline_mode<synchronous>, transform_indices = @transform_2, window_bounds = array<i64: 1, 64>}, {pipeline_mode = #tpu.pipeline_mode<synchronous>, transform_indices = @transform_3, window_bounds = array<i64: 1, 64>}, {pipeline_mode = #tpu.pipeline_mode<synchronous>, transform_indices = @transform_4, window_bounds = array<i64: 1, 1>}, {transform_indices = @transform_5, window_bounds = array<i64: 1, 1, 256>}]} {
    %c0 = arith.constant 0 : index
    %c0_0 = arith.constant 0 : index
    %0 = vector.load %arg1[%c0, %c0_0] : memref<256x128xf32, #tpu.memory_space<vmem>>, vector<256x128xf32>
    %c0_1 = arith.constant 0 : index
    %c0_2 = arith.constant 0 : index
    %1 = vector.load %arg2[%c0_1, %c0_2] : memref<128x64xf32, #tpu.memory_space<vmem>>, vector<128x64xf32>
    %cst = arith.constant dense<0.000000e+00> : vector<256x64xf32>
    %2 = tpu.matmul %0, %1, %cst {dimension_numbers = #tpu.dot_dimension_numbers<[1], [0], [0], [1], [0, 0, 1, 1], [], []>} : vector<256x128xf32>, vector<128x64xf32>, vector<256x64xf32> -> vector<256x64xf32>
    %c0_3 = arith.constant 0 : index
    %c0_4 = arith.constant 0 : index
    %3 = vector.load %arg3[%c0_3, %c0_4] : memref<1x64xf32, #tpu.memory_space<vmem>>, vector<1x64xf32>
    %4 = vector.broadcast %3 : vector<1x64xf32> to vector<256x64xf32>
    %5 = arith.addf %2, %4 : vector<256x64xf32>
    %cst_5 = arith.constant 0.000000e+00 : f32
    %6 = vector.broadcast %cst_5 : f32 to vector<256x64xf32>
    %7 = arith.cmpf oge, %5, %6 : vector<256x64xf32>
    %cst_6 = arith.constant 0.00999999977 : f32
    %8 = vector.broadcast %cst_6 : f32 to vector<256x64xf32>
    %9 = arith.mulf %8, %5 : vector<256x64xf32>
    %10 = arith.select %7, %5, %9 : vector<256x64xi1>, vector<256x64xf32>
    %c0_7 = arith.constant 0 : index
    %c0_8 = arith.constant 0 : index
    %11 = vector.load %arg4[%c0_7, %c0_8] : memref<1x64xf32, #tpu.memory_space<vmem>>, vector<1x64xf32>
    %cst_9 = arith.constant dense<0.000000e+00> : vector<1x256xf32>
    %12 = tpu.matmul %11, %10, %cst_9 {dimension_numbers = #tpu.dot_dimension_numbers<[1], [1], [0], [0], [0, 0, 1, 0], [], []>} : vector<1x64xf32>, vector<256x64xf32>, vector<1x256xf32> -> vector<1x256xf32>
    %c0_10 = arith.constant 0 : index
    %c0_11 = arith.constant 0 : index
    %13 = vector.load %arg5[%c0_10, %c0_11] : memref<1x1xf32, #tpu.memory_space<vmem>>, vector<1x1xf32>
    %14 = vector.broadcast %13 : vector<1x1xf32> to vector<1x256xf32>
    %15 = arith.addf %12, %14 : vector<1x256xf32>
    %cst_12 = arith.constant 0.000000e+00 : f32
    %16 = vector.broadcast %cst_12 : f32 to vector<1x256xf32>
    %17 = arith.cmpf oge, %15, %16 : vector<1x256xf32>
    %cst_13 = arith.constant 0.00999999977 : f32
    %18 = vector.broadcast %cst_13 : f32 to vector<1x256xf32>
    %19 = arith.mulf %18, %15 : vector<1x256xf32>
    %20 = arith.select %17, %15, %19 : vector<1x256xi1>, vector<1x256xf32>
    %21 = arith.negf %20 : vector<1x256xf32>
    %22 = math.exp %21 : vector<1x256xf32>
    %cst_14 = arith.constant 1.000000e+00 : f32
    %23 = vector.broadcast %cst_14 : f32 to vector<1x256xf32>
    %24 = arith.addf %23, %22 : vector<1x256xf32>
    %25 = arith.divf %23, %24 : vector<1x256xf32>
    %26 = vector.shape_cast %25 : vector<1x256xf32> to vector<1x1x256xf32>
    %c0_15 = arith.constant 0 : index
    %c0_16 = arith.constant 0 : index
    %c0_17 = arith.constant 0 : index
    %27 = vector.load %arg6[%c0_15, %c0_16, %c0_17] : memref<1x1x256xf32, #tpu.memory_space<vmem>>, vector<1x1x256xf32>
    tpu.vector_store %arg6[%c0_15, %c0_16, %c0_17], %26 {strides = array<i32>} : memref<1x1x256xf32, #tpu.memory_space<vmem>>, vector<1x1x256xf32>,
    return
  }
  func.func @transform_0(%arg0: i32) -> (i32, i32) {
    %c0_i32 = arith.constant 0 : i32
    %c0_i32_0 = arith.constant 0 : i32
    return %arg0, %c0_i32 : i32, i32
  }
  func.func @transform_1(%arg0: i32) -> (i32, i32) {
    %c0_i32 = arith.constant 0 : i32
    %c0_i32_0 = arith.constant 0 : i32
    %c0_i32_1 = arith.constant 0 : i32
    return %c0_i32, %c0_i32_0 : i32, i32
  }
  func.func @transform_2(%arg0: i32) -> (i32, i32) {
    %c0_i32 = arith.constant 0 : i32
    %c0_i32_0 = arith.constant 0 : i32
    %c0_i32_1 = arith.constant 0 : i32
    return %c0_i32, %c0_i32_0 : i32, i32
  }
  func.func @transform_3(%arg0: i32) -> (i32, i32) {
    %c0_i32 = arith.constant 0 : i32
    %c0_i32_0 = arith.constant 0 : i32
    %c0_i32_1 = arith.constant 0 : i32
    return %c0_i32, %c0_i32_0 : i32, i32
  }
  func.func @transform_4(%arg0: i32) -> (i32, i32) {
    %c0_i32 = arith.constant 0 : i32
    %c0_i32_0 = arith.constant 0 : i32
    %c0_i32_1 = arith.constant 0 : i32
    return %c0_i32, %c0_i32_0 : i32, i32
  }
  func.func @transform_5(%arg0: i32) -> (i32, i32, i32) {
    %c0_i32 = arith.constant 0 : i32
    %c0_i32_0 = arith.constant 0 : i32
    %c0_i32_1 = arith.constant 0 : i32
    return %arg0, %c0_i32, %c0_i32_0 : i32, i32, i32
  }
}

</mosaic_0001>

<bundles_post_ra>
// kernel: decoder_forward.1
= control target key start
LH: loop header
LB: loop body
LE: loop exit
PB: predicated region body
PF: predicated region fallthrough
CT: control target
= control target key end

     0   :  { %s1678_s0 = inlined_call_operand.vmem [shape: f32[512,128], index: 0, kind: input, shape index: {}]   ;;  %s1679_s1 = inlined_call_operand.vmem [shape: f32[128,64], index: 1, kind: input, shape index: {}]   ;;  %s1680_s2 = inlined_call_operand.vmem [shape: f32[1,64], index: 2, kind: input, shape index: {}]   ;;  %s1681_s3 = inlined_call_operand.vmem [shape: f32[1,64], index: 3, kind: input, shape index: {}]   ;;  %s1682_s4 = inlined_call_operand.<no memory space> [shape: f32[1,1], index: 4, kind: input, shape index: {}]   ;;  %s1683_s5 = inlined_call_operand.hbm [shape: f32[2,1,256], index: 5, kind: output, shape index: {}]  }
   0x1   :  { %v10_v0 = vstv %s1682_s4 }
   0x2   :  { %11 = vst [vmem:[#allocation2] sm:$0x1] %v10_v0 }
   0x3   :  { %12 = vsyncpa [#allocation4], 0 }
   0x4   :  { %14 = vsyncpa [#allocation4 + $0x1], 0  ;;  %s1341_s20 = smov 0   ;;  %s1343_s21 = smov 0  }
   0x5   :  { %s1345_s22 = smov 0   ;;  %s1347_s23 = smov 0  }
   0x6 LB: > { %s899_s4 = sadd.s32 4294967295, %s1303_s23   ;;  %s900_s24 = sadd.s32 4294967294, %s1303_s23   ;;  %s1303_s23 = sphi %s1347_s23, %s1691_s23   ;;  %s1299_s22 = sphi %s1345_s22, %s1690_s22   ;;  %s1295_s21 = sphi %s1343_s21, %s1689_s21   ;;  %s1291_s20 = sphi %s1341_s20, %s1688_s20  }
   0x7   : > { %s1364_s25 = sadd.s32 1, %s1303_s23   ;;  %s137_s26 = sadd.s32 1, %s1299_s22 }
   0x8   : > { %s134_s27 = ssub.s32 %s1303_s23, %s1364_s25  ;;  %p147_p0 = scmp.ne.s32.totalorder %s1299_s22, %s1295_s21 }
   0x9   : > { %p135_p1 = scmp.eq.s32.totalorder %s134_s27, 0  ;;  %p148_p2 = scmp.eq.s32.totalorder %s899_s4, 1 }
   0xa   : > { %p153_p3 = scmp.ne.s32.totalorder %s1295_s21, %s1291_s20  ;;  %p154_p4 = scmp.eq.s32.totalorder %s900_s24, 1 }
   0xb   : > { %s1374_s28 = scalar_select %p135_p1, %s1299_s22, %s137_s26  }
   0xc   : > { %p1376_p5 = por %p148_p2, %p147_p0  ;;  %p1380_p6 = por %p154_p4, %p153_p3 }
   0xd   : > { %p903_p7 = scmp.ge.s32.totalorder %s1303_s23, 1  ;;  %p193_p8 = scmp.lt.s32.totalorder %s1303_s23, 3 }
   0xf   : > { %p194_p9 = pnand %p903_p7, %p193_p8 }
  0x10   : > { %v259_v1 = vld [vmem:[%s1679_s1] sm:$0xff] (!%p194_p9)  ;;  %v260_v2 = vld [vmem:[%s1679_s1 + $0x8] sm:$0xff] (!%p194_p9)  ;;  %v261_v3 = vld [vmem:[%s1679_s1 + $0x10] sm:$0xff] (!%p194_p9)  ;;  %s1395_s12 = sshll.u32 (!%p194_p9), %s899_s4, 5  ;;  %vm614_vm0 = vcmask (!%p194_p9), 523264   ;;  %v1305_v59 = vmov (!%p194_p9), 0  }
  0x11   : > { %197 = sbr.rel (%p194_p9) target bundleno = 631 (0x277), region = 40  ;;  %v1111_v4 = vpack.c.bf16 (!%p194_p9), %v260_v2, %v259_v1  ;;  %v262_v5 = vld [vmem:[%s1679_s1 + $0x18] sm:$0xff] (!%p194_p9)  ;;  %p222_p10 = scmp.lt.s32.totalorder (!%p194_p9), %s1395_s12, 63  ;;  %v263_v7 = vld [vmem:[%s1679_s1 + $0x20] sm:$0xff] (!%p194_p9)  ;;  %v264_v8 = vld [vmem:[%s1679_s1 + $0x28] sm:$0xff] (!%p194_p9)  ;;  %1232 = vset.pattern.permute.xlu0 (!%p194_p9), %v1305_v59 }
  0x12   : > { %v1115_v6 = vpack.c.bf16 (!%p194_p9), %v262_v5, %v261_v3  ;;  %v1119_v9 = vpack.c.bf16 (!%p194_p9), %v264_v8, %v263_v7  ;;  %v265_v10 = vld [vmem:[%s1679_s1 + $0x30] sm:$0xff] (!%p194_p9)  ;;  %v266_v11 = vld [vmem:[%s1679_s1 + $0x38] sm:$0xff] (!%p194_p9)  ;;  %v267_v14 = vld [vmem:[%s1679_s1 + $0x40] sm:$0xff] (!%p194_p9)  ;;  %s1307_s27 = smov (!%p194_p9), [#allocation3]  }
  0x13   : > { %1112 = vmatprep.subr.bf16.mxu0 (!%p194_p9), %v1111_v4  ;;  %v1123_v13 = vpack.c.bf16 (!%p194_p9), %v266_v11, %v265_v10  ;;  %v268_v15 = vld [vmem:[%s1679_s1 + $0x48] sm:$0xff] (!%p194_p9)  ;;  %v269_v17 = vld [vmem:[%s1679_s1 + $0x50] sm:$0xff] (!%p194_p9)  ;;  %v270_v18 = vld [vmem:[%s1679_s1 + $0x58] sm:$0xff] (!%p194_p9)  ;;  %s1245_s6 = sshll.u32 (!%p194_p9), %s1307_s27, 4  ;;  %s1246_s6 = int_to_ptr.vmem [resolvable:$false] %s1245_s6 }
  0x14   : > { %1114 = vmatpush3.bf16.msra.mxu0 (!%p194_p9), %v1111_v4  ;;  %v1127_v16 = vpack.c.bf16 (!%p194_p9), %v268_v15, %v267_v14  ;;  %v1131_v19 = vpack.c.bf16 (!%p194_p9), %v270_v18, %v269_v17  ;;  %v271_v20 = vld [vmem:[%s1679_s1 + $0x60] sm:$0xff] (!%p194_p9)  ;;  %v272_v21 = vld [vmem:[%s1679_s1 + $0x68] sm:$0xff] (!%p194_p9)  ;;  %v273_v23 = vld [vmem:[%s1679_s1 + $0x70] sm:$0xff] (!%p194_p9)  ;;  %s1247_s7 = scalar_lea.vmem (!%p194_p9), %s1246_s6, 64 }
  0x15   : > { %1116 = vmatprep.subr.bf16.mxu0 (!%p194_p9), %v1115_v6  ;;  %v1135_v22 = vpack.c.bf16 (!%p194_p9), %v272_v21, %v271_v20  ;;  %v274_v24 = vld [vmem:[%s1679_s1 + $0x78] sm:$0xff] (!%p194_p9)  ;;  %v1478_v57 = vld [vmem:[%s1681_s3] sm:$0x1] (!%p194_p9) }
  0x16   : > { %v1139_v25 = vpack.c.bf16 (!%p194_p9), %v274_v24, %v273_v23  ;;  %1029 = vmatprep.mubr.msk.f32.mxu1 (!%p194_p9), %vm614_vm0, %v1478_v57  ;;  %v604_v58 = vld [vmem:[#allocation2] sm:$0x1] (!%p194_p9) }
  0x17   : > { %607 = vperm.xlu0 (!%p194_p9), %1232, %v604_v58   ;;  %v1485_v60 = vld [vmem:[%s1680_s2] ss:$0 sm:$0xff] (!%p194_p9) }
  0x18   : > { %s223_s19 = scalar_select %p222_p10, %s1395_s12, 63  ;;  %1118 = vmatpush3.bf16.msra.mxu0 %v1115_v6 }
  0x19   : > { %1120 = vmatprep.subr.bf16.mxu0 %v1119_v9 }
  0x1a   : > { %s906_s4 = sshll.u32 %s223_s19, 3 }
  0x1b   : > { %s1417_s9 = scalar_lea.vmem %s1678_s0, %s906_s4  ;;  %s1636_s4 = scalar_lea.hbm %s1683_s5, %s1395_s12 }
  0x1c   : > { %v227_v12 = vld [vmem:[%s1417_s9] sm:$0xff]  ;;  %1122 = vmatpush3.bf16.msra.mxu0 %v1119_v9  ;;  %v228_v26 = vld [vmem:[%s1417_s9 + $0x8] sm:$0xff]  ;;  %v229_v27 = vld [vmem:[%s1417_s9 + $0x10] sm:$0xff] }
  0x1d   : > { %1063 = vmatprep.mubr.f32.mxu0 %v227_v12  ;;  %1124 = vmatprep.subr.bf16.mxu0 %v1123_v13  ;;  %v230_v28 = vld [vmem:[%s1417_s9 + $0x18] sm:$0xff]  ;;  %v231_v29 = vld [vmem:[%s1417_s9 + $0x20] sm:$0xff]  ;;  %v232_v30 = vld [vmem:[%s1417_s9 + $0x28] sm:$0xff] }
  0x1e   : > { %v233_v31 = vld [vmem:[%s1417_s9 + $0x30] sm:$0xff]  ;;  %v234_v32 = vld [vmem:[%s1417_s9 + $0x38] sm:$0xff]  ;;  %v235_v33 = vld [vmem:[%s1417_s9 + $0x40] sm:$0xff] }
  0x1f   : > { %v236_v34 = vld [vmem:[%s1417_s9 + $0x48] sm:$0xff]  ;;  %v237_v35 = vld [vmem:[%s1417_s9 + $0x50] sm:$0xff]  ;;  %v238_v36 = vld [vmem:[%s1417_s9 + $0x58] sm:$0xff] }
  0x20   : > { %1126 = vmatpush3.bf16.msra.mxu0 %v1123_v13  ;;  %v239_v37 = vld [vmem:[%s1417_s9 + $0x60] sm:$0xff]  ;;  %v240_v38 = vld [vmem:[%s1417_s9 + $0x68] sm:$0xff]  ;;  %v241_v39 = vld [vmem:[%s1417_s9 + $0x70] sm:$0xff] }
  0x21   : > { %1128 = vmatprep.subr.bf16.mxu0 %v1127_v16  ;;  %v242_v40 = vld [vmem:[%s1417_s9 + $0x78] sm:$0xff]  ;;  %v243_v41 = vld [vmem:[%s1417_s9 + $0x80] sm:$0xff]  ;;  %v244_v42 = vld [vmem:[%s1417_s9 + $0x88] sm:$0xff] }
  0x22   : > { %v245_v43 = vld [vmem:[%s1417_s9 + $0x90] sm:$0xff]  ;;  %v246_v44 = vld [vmem:[%s1417_s9 + $0x98] sm:$0xff]  ;;  %v247_v45 = vld [vmem:[%s1417_s9 + $0xa0] sm:$0xff] }
  0x23   : > { %v248_v46 = vld [vmem:[%s1417_s9 + $0xa8] sm:$0xff]  ;;  %v249_v47 = vld [vmem:[%s1417_s9 + $0xb0] sm:$0xff]  ;;  %v250_v48 = vld [vmem:[%s1417_s9 + $0xb8] sm:$0xff] }
  0x24   : > { %1130 = vmatpush3.bf16.msra.mxu0 %v1127_v16  ;;  %v251_v49 = vld [vmem:[%s1417_s9 + $0xc0] sm:$0xff]  ;;  %v252_v50 = vld [vmem:[%s1417_s9 + $0xc8] sm:$0xff]  ;;  %v253_v51 = vld [vmem:[%s1417_s9 + $0xd0] sm:$0xff] }
  0x25   : > { %1132 = vmatprep.subr.bf16.mxu0 %v1131_v19  ;;  %v254_v52 = vld [vmem:[%s1417_s9 + $0xd8] sm:$0xff]  ;;  %v255_v53 = vld [vmem:[%s1417_s9 + $0xe0] sm:$0xff]  ;;  %v256_v54 = vld [vmem:[%s1417_s9 + $0xe8] sm:$0xff] }
  0x26   : > { %v257_v55 = vld [vmem:[%s1417_s9 + $0xf0] sm:$0xff]  ;;  %v258_v56 = vld [vmem:[%s1417_s9 + $0xf8] sm:$0xff]  ;;  %s218_s9 = sand.u32 1, %s1295_s21  }
  0x27   : > { %s904_s15 = sshll.u32 %s218_s9, 1  ;;  %s827_s24 = scalar_lea.sflag [#allocation4], %s218_s9 }
  0x28   : > { %1134 = vmatpush3.bf16.msra.mxu0 %v1131_v19  ;;  %s220_s16 = scalar_lea.vmem [#allocation3], %s904_s15 }
  0x29   : > { %1136 = vmatprep.subr.bf16.mxu0 %v1135_v22  ;;  %s841_s17 = sshll.u32 %s220_s16, 4  ;;  %s1638_s17 = int_to_ptr.vmem [resolvable:$true] %s841_s17 }
  0x2a   : > { %s1241_s26 = scalar_lea.vmem %s1638_s17, 32  ;;  %p1248_p0 = scmp.lt.s32.totalorder %s1638_s17, %s1246_s6 }
  0x2b   : > { %p1242_p11 = scmp.ne.s32.totalorder %s1638_s17, %s1241_s26  ;;  %p1249_p1 = scmp.lt.s32.totalorder %s1247_s7, %s1241_s26 }
  0x2c   : > { %1138 = vmatpush3.bf16.msra.mxu0 %v1135_v22 }
  0x2d   : > { %1140 = vmatprep.subr.bf16.mxu0 %v1139_v25  ;;  %p1243_p12 = pnand %p1242_p11, %p1376_p5  ;;  %p1250_p2 = por %p1249_p1, %p1248_p0 }
  0x2f   : > { %p1244_p13 = pneg %p1243_p12 }
  0x30   : > { %1142 = vmatpush3.bf16.msra.mxu0 %v1139_v25 }
  0x31   : > { %p1251_p3 = pnand %p1250_p2, %p1244_p13 }
  0x33   : > { %1064 = vmatmul.mubr.f32.vlgmr.msra.gmra.mrb[0].mxu0 %v228_v26 }
  0x34   : > { %1066 = vmatprep.mubr.f32.mxu0 %v229_v27 }
  0x37   : > { %1067 = vmatmul.mubr.f32.gmra.mrb[2].mxu0 %v230_v28 }
  0x38   : > { %1069 = vmatprep.mubr.f32.mxu0 %v231_v29 }
  0x3b   : > { %1070 = vmatmul.mubr.f32.gmra.mrb[4].mxu0 %v232_v30 }
  0x3c   : > { %1072 = vmatprep.mubr.f32.mxu0 %v233_v31 }
  0x3f   : > { %1073 = vmatmul.mubr.f32.gmra.mrb[6].mxu0 %v234_v32 }
  0x40   : > { %1075 = vmatprep.mubr.f32.mxu0 %v235_v33 }
  0x43   : > { %1076 = vmatmul.mubr.f32.gmra.mrb[8].mxu0 %v236_v34 }
  0x44   : > { %1078 = vmatprep.mubr.f32.mxu0 %v237_v35 }
  0x47   : > { %1079 = vmatmul.mubr.f32.gmra.mrb[10].mxu0 %v238_v36 }
  0x48   : > { %1081 = vmatprep.mubr.f32.mxu0 %v239_v37 }
  0x4b   : > { %1082 = vmatmul.mubr.f32.gmra.mrb[12].mxu0 %v240_v38 }
  0x4c   : > { %1084 = vmatprep.mubr.f32.mxu0 %v241_v39 }
  0x4f   : > { %1085 = vmatmul.mubr.f32.gmra.mrb[14].mxu0 %v242_v40 }
  0x50   : > { %1087 = vmatprep.mubr.f32.mxu0 %v243_v41 }
  0x53   : > { %1088 = vmatmul.mubr.f32.gmra.mrb[16].mxu0 %v244_v42 }
  0x54   : > { %1090 = vmatprep.mubr.f32.mxu0 %v245_v43 }
  0x57   : > { %1091 = vmatmul.mubr.f32.gmra.mrb[18].mxu0 %v246_v44 }
  0x58   : > { %1093 = vmatprep.mubr.f32.mxu0 %v247_v45 }
  0x5b   : > { %1094 = vmatmul.mubr.f32.gmra.mrb[20].mxu0 %v248_v46 }
  0x5c   : > { %1096 = vmatprep.mubr.f32.mxu0 %v249_v47 }
  0x5f   : > { %1097 = vmatmul.mubr.f32.gmra.mrb[22].mxu0 %v250_v48 }
  0x60   : > { %1099 = vmatprep.mubr.f32.mxu0 %v251_v49 }
  0x63   : > { %1100 = vmatmul.mubr.f32.gmra.mrb[24].mxu0 %v252_v50 }
  0x64   : > { %1102 = vmatprep.mubr.f32.mxu0 %v253_v51 }
  0x67   : > { %1103 = vmatmul.mubr.f32.gmra.mrb[26].mxu0 %v254_v52 }
  0x68   : > { %1105 = vmatprep.mubr.f32.mxu0 %v255_v53 }
  0x6b   : > { %1106 = vmatmul.mubr.f32.gmra.mrb[28].mxu0 %v256_v54 }
  0x6c   : > { %1108 = vmatprep.mubr.f32.mxu0 %v257_v55 }
  0x6f   : > { %1109 = vmatmul.mubr.f32.gmra.mrb[30].mxu0 %v258_v56 }
 0x106   : > { %v1065_v61 = vpop.f32.mrb[0].mxu0 }
 0x107   : > { %v354_v62 = vadd.f32 %v1065_v61, %v1485_v60  ;;  %v348_v63 = vpop.f32.mrb[1].mxu0 }
 0x108   : > { %v349_v0 = vadd.f32 %v1485_v60, %v348_v63 }
 0x109   : > { %vm508_vm1 = vcmp.ge.f32.partialorder %v354_v62, 0.0  ;;  %v540_v1 = vmul.f32 0.01, %v354_v62 }
 0x10a   : > { %vm507_vm2 = vcmp.ge.f32.partialorder %v349_v0, 0.0  ;;  %v539_v2 = vmul.f32 0.01, %v349_v0  ;;  %v1068_v3 = vpop.f32.mrb[2].mxu0 }
 0x10b   : > { %v364_v4 = vadd.f32 %v1068_v3, %v1485_v60  ;;  %v358_v5 = vpop.f32.mrb[3].mxu0  ;;  %v1490_v6 = vsel %vm508_vm1, %v354_v62, %v540_v1 }
 0x10c   : > { %v359_v7 = vadd.f32 %v1485_v60, %v358_v5  ;;  %v1493_v8 = vsel %vm507_vm2, %v349_v0, %v539_v2 }
 0x10d   : > { %vm510_vm3 = vcmp.ge.f32.partialorder %v364_v4, 0.0  ;;  %v542_v9 = vmul.f32 0.01, %v364_v4  ;;  %v1146_v10 = vpack.c.bf16 %v1490_v6, %v1493_v8 }
 0x10e   : > { %vm509_vm4 = vcmp.ge.f32.partialorder %v359_v7, 0.0  ;;  %v541_v11 = vmul.f32 0.01, %v359_v7  ;;  %v1071_v12 = vpop.f32.mrb[4].mxu0 }
 0x10f   : > { %v1497_v13 = vsel %vm510_vm3, %v364_v4, %v542_v9  ;;  %v374_v14 = vadd.f32 %v1071_v12, %v1485_v60  ;;  %v368_v15 = vpop.f32.mrb[5].mxu0 }
 0x110   : > { %v1500_v16 = vsel %vm509_vm4, %v359_v7, %v541_v11  ;;  %v369_v17 = vadd.f32 %v1485_v60, %v368_v15  ;;  %vm1557_vm4 = vmpackc.low %vm614_vm0, %vm614_vm0 }
 0x111   : > { %v1152_v18 = vpack.c.bf16 %v1497_v13, %v1500_v16  ;;  %vm512_vm5 = vcmp.ge.f32.partialorder %v374_v14, 0.0  ;;  %v544_v19 = vmul.f32 0.01, %v374_v14 }
 0x112   : > { %vm511_vm6 = vcmp.ge.f32.partialorder %v369_v17, 0.0  ;;  %v543_v20 = vmul.f32 0.01, %v369_v17  ;;  %v1074_v21 = vpop.f32.mrb[6].mxu0 }
 0x113   : > { %v1505_v22 = vsel %vm512_vm5, %v374_v14, %v544_v19  ;;  %v384_v23 = vadd.f32 %v1074_v21, %v1485_v60  ;;  %v378_v24 = vpop.f32.mrb[7].mxu0 }
 0x114   : > { %v1508_v25 = vsel %vm511_vm6, %v369_v17, %v543_v20  ;;  %v379_v26 = vadd.f32 %v1485_v60, %v378_v24 }
 0x115   : > { %v1158_v27 = vpack.c.bf16 %v1505_v22, %v1508_v25  ;;  %vm514_vm7 = vcmp.ge.f32.partialorder %v384_v23, 0.0  ;;  %v546_v28 = vmul.f32 0.01, %v384_v23 }
 0x116   : > { %vm513_vm8 = vcmp.ge.f32.partialorder %v379_v26, 0.0  ;;  %v545_v29 = vmul.f32 0.01, %v379_v26  ;;  %v1077_v30 = vpop.f32.mrb[8].mxu0 }
 0x117   : > { %v1513_v31 = vsel %vm514_vm7, %v384_v23, %v546_v28  ;;  %v394_v32 = vadd.f32 %v1077_v30, %v1485_v60  ;;  %v388_v33 = vpop.f32.mrb[9].mxu0 }
 0x118   : > { %v1516_v34 = vsel %vm513_vm8, %v379_v26, %v545_v29  ;;  %v389_v35 = vadd.f32 %v1485_v60, %v388_v33 }
 0x119   : > { %v1164_v36 = vpack.c.bf16 %v1513_v31, %v1516_v34  ;;  %vm516_vm9 = vcmp.ge.f32.partialorder %v394_v32, 0.0  ;;  %v548_v37 = vmul.f32 0.01, %v394_v32 }
 0x11a   : > { %vm515_vm10 = vcmp.ge.f32.partialorder %v389_v35, 0.0  ;;  %v547_v38 = vmul.f32 0.01, %v389_v35  ;;  %v1080_v39 = vpop.f32.mrb[10].mxu0 }
 0x11b   : > { %v1521_v40 = vsel %vm516_vm9, %v394_v32, %v548_v37  ;;  %v404_v41 = vadd.f32 %v1080_v39, %v1485_v60  ;;  %v398_v42 = vpop.f32.mrb[11].mxu0 }
 0x11c   : > { %v1524_v43 = vsel %vm515_vm10, %v389_v35, %v547_v38  ;;  %v399_v44 = vadd.f32 %v1485_v60, %v398_v42 }
 0x11d   : > { %v1170_v45 = vpack.c.bf16 %v1521_v40, %v1524_v43  ;;  %vm518_vm11 = vcmp.ge.f32.partialorder %v404_v41, 0.0  ;;  %v550_v46 = vmul.f32 0.01, %v404_v41 }
 0x11e   : > { %vm517_vm12 = vcmp.ge.f32.partialorder %v399_v44, 0.0  ;;  %v549_v47 = vmul.f32 0.01, %v399_v44  ;;  %v1083_v48 = vpop.f32.mrb[12].mxu0 }
 0x11f   : > { %v1529_v49 = vsel %vm518_vm11, %v404_v41, %v550_v46  ;;  %v414_v50 = vadd.f32 %v1083_v48, %v1485_v60  ;;  %v408_v51 = vpop.f32.mrb[13].mxu0 }
 0x120   : > { %v1532_v52 = vsel %vm517_vm12, %v399_v44, %v549_v47  ;;  %v409_v53 = vadd.f32 %v1485_v60, %v408_v51 }
 0x121   : > { %v1176_v54 = vpack.c.bf16 %v1529_v49, %v1532_v52  ;;  %vm520_vm13 = vcmp.ge.f32.partialorder %v414_v50, 0.0  ;;  %v552_v55 = vmul.f32 0.01, %v414_v50 }
 0x122   : > { %vm519_vm14 = vcmp.ge.f32.partialorder %v409_v53, 0.0  ;;  %v551_v56 = vmul.f32 0.01, %v409_v53  ;;  %v1086_v58 = vpop.f32.mrb[14].mxu0 }
 0x123   : > { %v1537_v59 = vsel %vm520_vm13, %v414_v50, %v552_v55  ;;  %v424_v61 = vadd.f32 %v1086_v58, %v1485_v60  ;;  %v418_v62 = vpop.f32.mrb[15].mxu0 }
 0x124   : > { %v1540_v63 = vsel %vm519_vm14, %v409_v53, %v551_v56  ;;  %v419_v0 = vadd.f32 %v1485_v60, %v418_v62 }
 0x125   : > { %v1182_v1 = vpack.c.bf16 %v1537_v59, %v1540_v63  ;;  %vm522_vm15 = vcmp.ge.f32.partialorder %v424_v61, 0.0  ;;  %v554_v2 = vmul.f32 0.01, %v424_v61 }
 0x126   : > { %vm521_vm1 = vcmp.ge.f32.partialorder %v419_v0, 0.0  ;;  %v553_v3 = vmul.f32 0.01, %v419_v0  ;;  %v1089_v4 = vpop.f32.mrb[16].mxu0 }
 0x127   : > { %v1545_v5 = vsel %vm522_vm15, %v424_v61, %v554_v2  ;;  %v434_v7 = vadd.f32 %v1089_v4, %v1485_v60  ;;  %v428_v9 = vpop.f32.mrb[17].mxu0 }
 0x128   : > { %v1548_v11 = vsel %vm521_vm1, %v419_v0, %v553_v3  ;;  %v429_v12 = vadd.f32 %v1485_v60, %v428_v9 }
 0x129   : > { %v1188_v14 = vpack.c.bf16 %v1545_v5, %v1548_v11  ;;  %v556_v15 = vmul.f32 0.01, %v434_v7  ;;  %vm524_vm2 = vcmp.ge.f32.partialorder %v434_v7, 0.0 }
 0x12a   : > { %v555_v17 = vmul.f32 0.01, %v429_v12  ;;  %v1092_v19 = vpop.f32.mrb[18].mxu0  ;;  %vm523_vm3 = vcmp.ge.f32.partialorder %v429_v12, 0.0 }
 0x12b   : > { %v444_v20 = vadd.f32 %v1092_v19, %v1485_v60  ;;  %v438_v21 = vpop.f32.mrb[19].mxu0  ;;  %v588_v23 = vsel %vm524_vm2, %v434_v7, %v556_v15 }
 0x12c   : > { %v439_v24 = vadd.f32 %v1485_v60, %v438_v21  ;;  %v587_v26 = vsel %vm523_vm3, %v429_v12, %v555_v17 }
 0x12d   : > { %vm526_vm5 = vcmp.ge.f32.partialorder %v444_v20, 0.0  ;;  %v558_v29 = vmul.f32 0.01, %v444_v20  ;;  %v1143_v30 = vpack.c.bf16 %v588_v23, %v587_v26 }
 0x12e   : > { %vm525_vm6 = vcmp.ge.f32.partialorder %v439_v24, 0.0  ;;  %v557_v32 = vmul.f32 0.01, %v439_v24  ;;  %v1095_v33 = vpop.f32.mrb[20].mxu0 }
 0x12f   : > { %v590_v35 = vsel %vm526_vm5, %v444_v20, %v558_v29  ;;  %1145 = vmatprep.subr.msk.bf16.mxu1 %vm1557_vm4, %v1143_v30  ;;  %v454_v37 = vadd.f32 %v1095_v33, %v1485_v60  ;;  %v448_v38 = vpop.f32.mrb[21].mxu0 }
 0x130   : > { %v589_v39 = vsel %vm525_vm6, %v439_v24, %v557_v32  ;;  %1148 = vmatpush3.bf16.xpose.msk.msra.mxu1 %vm1557_vm4, %v1146_v10  ;;  %v449_v41 = vadd.f32 %v1485_v60, %v448_v38 }
 0x131   : > { %v1149_v42 = vpack.c.bf16 %v590_v35, %v589_v39  ;;  %vm528_vm7 = vcmp.ge.f32.partialorder %v454_v37, 0.0  ;;  %v560_v44 = vmul.f32 0.01, %v454_v37 }
 0x132   : > { %vm527_vm8 = vcmp.ge.f32.partialorder %v449_v41, 0.0  ;;  %v559_v46 = vmul.f32 0.01, %v449_v41  ;;  %v1098_v47 = vpop.f32.mrb[22].mxu0 }
 0x133   : > { %v592_v48 = vsel %vm528_vm7, %v454_v37, %v560_v44  ;;  %1151 = vmatprep.subr.msk.bf16.mxu1 %vm1557_vm4, %v1149_v42  ;;  %v464_v50 = vadd.f32 %v1098_v47, %v1485_v60  ;;  %v458_v51 = vpop.f32.mrb[23].mxu0 }
 0x134   : > { %v591_v53 = vsel %vm527_vm8, %v449_v41, %v559_v46  ;;  %v459_v6 = vadd.f32 %v1485_v60, %v458_v51  ;;  %v1306_v51 = vmov 1966171168  }
 0x135   : > { %v1155_v8 = vpack.c.bf16 %v592_v48, %v591_v53  ;;  %vm530_vm9 = vcmp.ge.f32.partialorder %v464_v50, 0.0  ;;  %v562_v10 = vmul.f32 0.01, %v464_v50  ;;  %v807_v53 = vunpack.c.l.s4 %v1306_v51 }
 0x136   : > { %vm529_vm10 = vcmp.ge.f32.partialorder %v459_v6, 0.0  ;;  %v561_v55 = vmul.f32 0.01, %v459_v6  ;;  %v1101_v56 = vpop.f32.mrb[24].mxu0 }
 0x137   : > { %v594_v58 = vsel %vm530_vm9, %v464_v50, %v562_v10  ;;  %v474_v61 = vadd.f32 %v1101_v56, %v1485_v60  ;;  %v468_v62 = vpop.f32.mrb[25].mxu0 }
 0x138   : > { %1154 = vmatpush3.bf16.xpose.msk.msra.mxu1 %vm1557_vm4, %v1152_v18  ;;  %v593_v0 = vsel %vm529_vm10, %v459_v6, %v561_v55  ;;  %v469_v2 = vadd.f32 %v1485_v60, %v468_v62  ;;  %v808_v6 = vunpack.c.0.s8 %v807_v53 }
 0x139   : > { %v1161_v3 = vpack.c.bf16 %v594_v58, %v593_v0  ;;  %1157 = vmatprep.subr.msk.bf16.mxu1 %vm1557_vm4, %v1155_v8  ;;  %vm532_vm11 = vcmp.ge.f32.partialorder %v474_v61, 0.0  ;;  %v564_v4 = vmul.f32 0.01, %v474_v61 }
 0x13a   : > { %vm531_vm12 = vcmp.ge.f32.partialorder %v469_v2, 0.0  ;;  %v563_v7 = vmul.f32 0.01, %v469_v2  ;;  %v1104_v9 = vpop.f32.mrb[26].mxu0 }
 0x13b   : > { %v596_v12 = vsel %vm532_vm11, %v474_v61, %v564_v4  ;;  %v484_v15 = vadd.f32 %v1104_v9, %v1485_v60  ;;  %v478_v17 = vpop.f32.mrb[27].mxu0 }
 0x13c   : > { %v595_v13 = vsel %vm531_vm12, %v469_v2, %v563_v7  ;;  %v479_v16 = vadd.f32 %v1485_v60, %v478_v17 }
 0x13d   : > { %v1167_v18 = vpack.c.bf16 %v596_v12, %v595_v13  ;;  %vm534_vm13 = vcmp.ge.f32.partialorder %v484_v15, 0.0  ;;  %v566_v19 = vmul.f32 0.01, %v484_v15 }
 0x13e   : > { %vm533_vm14 = vcmp.ge.f32.partialorder %v479_v16, 0.0  ;;  %v565_v20 = vmul.f32 0.01, %v479_v16  ;;  %v1107_v21 = vpop.f32.mrb[28].mxu0 }
 0x13f   : > { %v598_v23 = vsel %vm534_vm13, %v484_v15, %v566_v19  ;;  %v494_v24 = vadd.f32 %v1107_v21, %v1485_v60  ;;  %v488_v26 = vpop.f32.mrb[29].mxu0 }
 0x140   : > { %1160 = vmatpush3.bf16.xpose.msk.msra.mxu1 %vm1557_vm4, %v1158_v27  ;;  %v597_v29 = vsel %vm533_vm14, %v479_v16, %v565_v20  ;;  %v489_v30 = vadd.f32 %v1485_v60, %v488_v26 }
 0x141   : > { %1163 = vmatprep.subr.msk.bf16.mxu1 %vm1557_vm4, %v1161_v3  ;;  %v1173_v32 = vpack.c.bf16 %v598_v23, %v597_v29  ;;  %vm536_vm15 = vcmp.ge.f32.partialorder %v494_v24, 0.0  ;;  %v568_v33 = vmul.f32 0.01, %v494_v24 }
 0x142   : > { %vm535_vm1 = vcmp.ge.f32.partialorder %v489_v30, 0.0  ;;  %v567_v35 = vmul.f32 0.01, %v489_v30  ;;  %v1110_v37 = vpop.f32.mrb[30].mxu0 }
 0x143   : > { %v600_v38 = vsel %vm536_vm15, %v494_v24, %v568_v33  ;;  %v504_v39 = vadd.f32 %v1110_v37, %v1485_v60  ;;  %v498_v41 = vpop.f32.mrb[31].mxu0 }
 0x144   : > { %v599_v22 = vsel %vm535_vm1, %v489_v30, %v567_v35  ;;  %v499_v25 = vadd.f32 %v1485_v60, %v498_v41  ;;  %v610_v60 = vlaneseq }
 0x145   : > { %v1179_v27 = vpack.c.bf16 %v600_v38, %v599_v22  ;;  %vm538_vm2 = vcmp.ge.f32.partialorder %v504_v39, 0.0  ;;  %v570_v42 = vmul.f32 0.01, %v504_v39 }
 0x146   : > { %vm537_vm3 = vcmp.ge.f32.partialorder %v499_v25, 0.0  ;;  %v569_v44 = vmul.f32 0.01, %v499_v25  ;;  %v611_v31 = vshrl.u32 %v610_v60, 7 }
 0x147   : > { %v602_v46 = vsel %vm538_vm2, %v504_v39, %v570_v42 }
 0x148   : > { %1166 = vmatpush3.bf16.xpose.msk.msra.mxu1 %vm1557_vm4, %v1164_v36  ;;  %v601_v47 = vsel %vm537_vm3, %v499_v25, %v569_v44  ;;  %v612_v34 = vsub.s32 0, %v611_v31  ;;  %v608_v36 = vpop.permute.xlu0 %607  ;;  %v811_v10 = vsub.s32 %v808_v6, %v611_v31 }
 0x149   : > { %1169 = vmatprep.subr.msk.bf16.mxu1 %vm1557_vm4, %v1167_v18  ;;  %v1185_v48 = vpack.c.bf16 %v602_v46, %v601_v47 }
 0x14a   : > { %v613_v40 = vrot.slane %v608_v36, %v612_v34 }
 0x150   : > { %1172 = vmatpush3.bf16.xpose.msk.msra.mxu1 %vm1557_vm4, %v1170_v45 }
 0x151   : > { %1175 = vmatprep.subr.msk.bf16.mxu1 %vm1557_vm4, %v1173_v32 }
 0x158   : > { %1178 = vmatpush3.bf16.xpose.msk.msra.mxu1 %vm1557_vm4, %v1176_v54 }
 0x159   : > { %1181 = vmatprep.subr.msk.bf16.mxu1 %vm1557_vm4, %v1179_v27 }
 0x160   : > { %1184 = vmatpush3.bf16.xpose.msk.msra.mxu1 %vm1557_vm4, %v1182_v1 }
 0x161   : > { %1187 = vmatprep.subr.msk.bf16.mxu1 %vm1557_vm4, %v1185_v48 }
 0x168   : > { %1190 = vmatpush3.bf16.xpose.msk.msra.mxu1 %vm1557_vm4, %v1188_v14 }
 0x16f   : > { %1030 = vmatmul.mubr.msk.f32.vlgmr.msra.gmra.mrb[0].mxu1 %vm614_vm0, %v1478_v57  ;;  %vm823_vm0 = vcmp.lt.s32.totalorder %v610_v60, 256 }
 0x242   : > { %v780_v43 = vpop.f32.mrb[0].mxu1 }
 0x243   : > { %v781_v45 = vadd.f32 %v780_v43, %v613_v40  ;;  %v782_v49 = vpop.f32.mrb[1].mxu1 }
 0x244   : > { %v783_v52 = vadd.f32 %v782_v49, %v613_v40 }
 0x245   : > { %vm785_vm5 = vcmp.ge.f32.partialorder %v781_v45, 0.0  ;;  %v787_v54 = vmul.f32 0.01, %v781_v45 }
 0x246   : > { %vm786_vm6 = vcmp.ge.f32.partialorder %v783_v52, 0.0  ;;  %v788_v59 = vmul.f32 0.01, %v783_v52 }
 0x247   : > { %v789_v63 = vsel %vm785_vm5, %v781_v45, %v787_v54 }
 0x248   : > { %v941_v1 = vmul.f32 -1.442695, %v789_v63  ;;  %v790_v5 = vsel %vm786_vm6, %v783_v52, %v788_v59 }
 0x249   : > { %v942_v11 = vmul.f32 -1.442695, %v790_v5 }
 0x24a   : > { %1233 = vpow2.f32 %v941_v1 }
 0x24b   : > { %1235 = vpow2.f32 %v942_v11 }
 0x254   : > { %v1234_v57 = vpop.eup %1233 }
 0x255   : > { %v1236_v14 = vpop.eup %1235  ;;  %v797_v28 = vadd.f32 1.0, %v1234_v57 }
 0x256   : > { %v798_v50 = vadd.f32 1.0, %v1236_v14 }
 0x257   : > { %1237 = vrcp.f32 %v797_v28 }
 0x258   : > { %1239 = vrcp.f32 %v798_v50 }
 0x261   : > { %v1238_v8 = vpop.eup %1237 }
 0x262   : > { %v1240_v55 = vpop.eup %1239 }
 0x263   : > { %v805_v56 = vcombine.low %v1238_v8, %v1240_v55 }
 0x265   : > { %v812_v58 = vrot.slane %v805_v56, %v811_v10 }
 0x267   : > { %v819_v61 = vrot.slane %v812_v58, %v811_v10 }
 0x269   : > { %825 = vst.msk [vmem:[%s220_s16] sm:$0x3] %vm823_vm0, %v819_v61 }
 0x26a   : > { %1254 = shalt.err (!%p1251_p3)
}
 0x26b   : > { %s1255_s12 = scalar_lea.hbm %s1636_s4, 32  ;;  %s1259_s11 = scalar_lea.hbm %s1683_s5, 64 }
 0x26c   : > { %p1256_p4 = scmp.ne.s32.totalorder %s1636_s4, %s1255_s12  ;;  %p1260_p9 = scmp.lt.u32.totalorder %s1636_s4, %s1683_s5 }
 0x26d   : > { %p1261_p10 = scmp.lt.u32.totalorder %s1259_s11, %s1255_s12  ;;  %p1263_p12 = scmp.lt.u32.totalorder %s1255_s12, %s1636_s4 }
 0x26e   : > { %p1257_p7 = pnand %p1256_p4, %p1376_p5 }
 0x26f   : > { %p1262_p11 = por %p1261_p10, %p1260_p9 }
 0x270   : > { %p1258_p8 = pneg %p1257_p7 }
 0x271   : > { %p1264_p13 = por %p1263_p12, %p1262_p11 }
 0x273   : > { %p1265_p0 = pnand %p1264_p13, %p1258_p8 }
 0x275   : > { %1268 = shalt.err (!%p1265_p0)
}
 0x276   : > { %1191 = dma.vmem_to_hbm [thread:$0]  (%p1376_p5), %s1638_s17, 32, %s1636_s4, %s827_s24  }
 0x277 PF: > { %p1197_p1 = scmp.ge.s32.totalorder %s1303_s23, 2  ;;  %s853_s9 = sand.u32 1, %s1291_s20  }
 0x278   : > { %s854_s15 = scalar_lea.sflag [#allocation4], %s853_s9 }
 0x279   : > { %p1194_p2 = pnand %p1197_p1, %p1380_p6 }
 0x27b   : > { %1286 = dma.done.wait (!%p1194_p2), %s854_s15, 32  }
 0x27c   : > { %1288 = vsyncadd (!%p1194_p2), %s854_s15, 4294967264  ;;  %p17_p3 = scmp.ge.s32.totalorder %s1364_s25, 4   ;;  %s1688_s20 = smov %s1295_s21 }
 0x27d   : > { %s1689_s21 = smov %s1299_s22  ;;  %s1690_s22 = smov %s1374_s28 }
 0x27e   : > { %s1691_s23 = smov %s1364_s25  ;;  %19 = sbr.rel (!%p17_p3) target bundleno = 6 (0x6), region = 75 }
 0x285   :  { %859 = vsyncpa [#allocation4], 1 }
 0x286   :  { %861 = vsyncpa [#allocation4 + $0x1], 1 }

</bundles_post_ra>
